<compile_context>
chip_gen: v5e
topology: v5e:2x2
jax: 0.10.0
libtpu: 0.0.40
codegen_flags: <defaults>
</compile_context>

<pallas_src>
import jax
import jax.numpy as jnp
from jax.experimental import pallas as pl
from jax.experimental.pallas import tpu as pltpu


C_PAD = 128    # lane quantum for the class/logit dim


# ---------------------------------------------------------------------------
# Pallas kernel: fused MLP forward  out = relu(x @ W1 + b1) @ W2 + b2
# ---------------------------------------------------------------------------
def _mlp_kernel(x_ref, w1_ref, b1_ref, w2_ref, b2_ref, out_ref):
    x = x_ref[...]                       # (B, D)   f32 (cast to bf16 in-kernel)
    w1 = w1_ref[...]                     # (D, H)   bf16
    b1 = b1_ref[...]                     # (1, H)   f32
    w2 = w2_ref[...]                     # (H, Cp)  bf16
    b2 = b2_ref[...]                     # (1, Cp)  f32

    # Linear 1: bf16 MXU matmul with f32 accumulation, f32 bias + ReLU.
    x_bf = x.astype(jnp.bfloat16)
    h = jnp.dot(x_bf, w1, preferred_element_type=jnp.float32)
    h = jnp.maximum(h + b1, 0.0)

    # Linear 2: bf16 MXU matmul (single pass), f32 accumulation + f32 bias.
    out_ref[...] = (
        jnp.dot(h.astype(jnp.bfloat16), w2, preferred_element_type=jnp.float32)
        + b2
    )


def mlp_forward_pallas(x_f32, w1_bf16, b1, w2_bf16, b2):
    """x_f32: (B, D) float32 -> padded logits (B, Cp) float32."""
    B, D = x_f32.shape
    H = w1_bf16.shape[1]
    Cp = w2_bf16.shape[1]

    flops = 2 * B * D * H + 2 * B * H * Cp
    bytes_accessed = (
        B * D * 4             # x (f32)
        + D * H * 2           # w1 (bf16)
        + H * 4               # b1 (f32)
        + H * Cp * 2          # w2 (bf16)
        + Cp * 4              # b2 (f32)
        + B * Cp * 4          # out (f32)
    )

    vmem_spec = pl.BlockSpec(memory_space=pltpu.MemorySpace.VMEM)
    return pl.pallas_call(
        _mlp_kernel,
        out_shape=jax.ShapeDtypeStruct((B, Cp), jnp.float32),
        in_specs=[vmem_spec] * 5,
        out_specs=vmem_spec,
        cost_estimate=pl.CostEstimate(
            flops=flops, transcendentals=0, bytes_accessed=bytes_accessed),
    )(x_f32, w1_bf16, b1, w2_bf16, b2)


# ---------------------------------------------------------------------------
# ModelWrapper equivalent
# ---------------------------------------------------------------------------
class ModelWrapperPallas:
    """Mirrors advbench ModelWrapper: forward(x) == self.model(x)."""

    def __init__(self, model_fn, loss_fn):
        self.model = model_fn
        self.loss = loss_fn          # stored but unused in forward (as in torch)

    def forward(self, x):
        return self.model(x)

    def __call__(self, x):
        return self.forward(x)

    # TODO(synk): no Pallas equivalent for torch export()/unexport() mode toggles.
    def export(self):
        pass

    def unexport(self):
        pass


def make_mlp_model(in_dim, hidden_dim, num_classes, key):
    """Deterministic parameter init (synthetic, not a checkpoint)."""
    k1, k2 = jax.random.split(key)
    w1 = jax.random.normal(k1, (in_dim, hidden_dim), jnp.float32) * (
        1.0 / jnp.sqrt(in_dim))
    b1 = jnp.zeros((1, hidden_dim), jnp.float32)
    w2 = jax.random.normal(k2, (hidden_dim, num_classes), jnp.float32) * (
        1.0 / jnp.sqrt(hidden_dim))
    b2 = jnp.zeros((1, num_classes), jnp.float32)

    # Kernel-side parameters:
    #  * w1, w2 cast to bf16 (halved weight DMA, single-pass bf16 MXU)
    #  * w2/b2 zero-padded along the class dim to 128 lanes (lane-dense store)
    w1_k = w1.astype(jnp.bfloat16)
    w2_k = (jnp.zeros((hidden_dim, C_PAD), jnp.float32)
            .at[:, :num_classes].set(w2).astype(jnp.bfloat16))
    b2_k = jnp.zeros((1, C_PAD), jnp.float32).at[:, :num_classes].set(b2)

    @jax.jit
    def model_fn(x_nchw):
        # torch-style flatten: x.view(x.size(0), -1) on NCHW input.
        B = x_nchw.shape[0]
        x_flat = x_nchw.reshape(B, -1)          # (B, D) f32, no pad / no cast
        logits_pad = mlp_forward_pallas(x_flat, w1_k, b1, w2_k, b2_k)
        # Padded class columns are exact zeros; this slice fuses inside jit.
        return logits_pad[:, :num_classes]

    return model_fn, (w1, b1, w2, b2)


def _cross_entropy(logits, labels):
    # jnp equivalent of torch.nn.functional.cross_entropy (mean reduction);
    # stored on the wrapper for parity, not used in forward.
    logz = jax.nn.logsumexp(logits, axis=-1)
    nll = logz - jnp.take_along_axis(logits, labels[:, None], axis=-1)[:, 0]
    return jnp.mean(nll)


if __name__ == "__main__":
    key = jax.random.PRNGKey(0)
    k_x, k_params = jax.random.split(key)

    B, C, Himg, Wimg = 2, 4, 16, 16       # NCHW example input
    hidden_dim = 128
    num_classes = 10
    in_dim = C * Himg * Wimg              # 1024

    x = jax.random.normal(k_x, (B, C, Himg, Wimg), jnp.float32)

    model_fn, _params = make_mlp_model(in_dim, hidden_dim, num_classes, k_params)
    wrapper = ModelWrapperPallas(model_fn, _cross_entropy)

    logits = wrapper(x)
    jax.block_until_ready(logits)

    assert logits.shape == (B, num_classes)
    assert logits.dtype == jnp.float32

    # Pure-JAX reference of the kernel math (bf16 matmul inputs, f32 accum).
    w1, b1, w2, b2 = _params
    x_flat = x.reshape(B, -1)
    x_bf = x_flat.astype(jnp.bfloat16).astype(jnp.float32)
    w1_bf = w1.astype(jnp.bfloat16).astype(jnp.float32)
    h_ref = jnp.maximum(
        jnp.dot(x_bf, w1_bf, precision=jax.lax.Precision.HIGHEST) + b1, 0.0)
    h_bf = h_ref.astype(jnp.bfloat16).astype(jnp.float32)
    w2_bf = w2.astype(jnp.bfloat16).astype(jnp.float32)
    ref = jnp.dot(h_bf, w2_bf, precision=jax.lax.Precision.HIGHEST) + b2
    assert jnp.allclose(logits, ref, atol=5e-2, rtol=5e-2), (
        float(jnp.max(jnp.abs(logits - ref))))

    print("KERNEL_OK")
</pallas_src>

<mosaic_0001>
module attributes {stable_mosaic.version = 11 : i64} {
  func.func @_mlp_kernel(%arg0: memref<2x1024xf32, #tpu.memory_space<vmem>>, %arg1: memref<1024x128xbf16, #tpu.memory_space<vmem>>, %arg2: memref<1x128xf32, #tpu.memory_space<vmem>>, %arg3: memref<128x128xbf16, #tpu.memory_space<vmem>>, %arg4: memref<1x128xf32, #tpu.memory_space<vmem>>, %arg5: memref<2x128xf32, #tpu.memory_space<vmem>>) attributes {dimension_semantics = [], scalar_prefetch = 0 : i64, scratch_operands = 0 : i64, tpu.core_type = #tpu.core_type<tc>} {
    %c0 = arith.constant 0 : index
    %c0_0 = arith.constant 0 : index
    %0 = vector.load %arg0[%c0, %c0_0] : memref<2x1024xf32, #tpu.memory_space<vmem>>, vector<2x1024xf32>
    %c0_1 = arith.constant 0 : index
    %c0_2 = arith.constant 0 : index
    %1 = vector.load %arg1[%c0_1, %c0_2] : memref<1024x128xbf16, #tpu.memory_space<vmem>>, vector<1024x128xbf16>
    %c0_3 = arith.constant 0 : index
    %c0_4 = arith.constant 0 : index
    %2 = vector.load %arg2[%c0_3, %c0_4] : memref<1x128xf32, #tpu.memory_space<vmem>>, vector<1x128xf32>
    %c0_5 = arith.constant 0 : index
    %c0_6 = arith.constant 0 : index
    %3 = vector.load %arg3[%c0_5, %c0_6] : memref<128x128xbf16, #tpu.memory_space<vmem>>, vector<128x128xbf16>
    %c0_7 = arith.constant 0 : index
    %c0_8 = arith.constant 0 : index
    %4 = vector.load %arg4[%c0_7, %c0_8] : memref<1x128xf32, #tpu.memory_space<vmem>>, vector<1x128xf32>
    %5 = arith.truncf %0 : vector<2x1024xf32> to vector<2x1024xbf16>
    %cst = arith.constant dense<0.000000e+00> : vector<2x128xf32>
    %6 = tpu.matmul %5, %1, %cst {dimension_numbers = #tpu.dot_dimension_numbers<[1], [0], [0], [1], [0, 0, 1, 1], [], []>} : vector<2x1024xbf16>, vector<1024x128xbf16>, vector<2x128xf32> -> vector<2x128xf32>
    %7 = vector.broadcast %2 : vector<1x128xf32> to vector<2x128xf32>
    %8 = arith.addf %6, %7 : vector<2x128xf32>
    %cst_9 = arith.constant 0.000000e+00 : f32
    %9 = vector.broadcast %cst_9 : f32 to vector<2x128xf32>
    %10 = arith.maximumf %8, %9 : vector<2x128xf32>
    %11 = arith.truncf %10 : vector<2x128xf32> to vector<2x128xbf16>
    %cst_10 = arith.constant dense<0.000000e+00> : vector<2x128xf32>
    %12 = tpu.matmul %11, %3, %cst_10 {dimension_numbers = #tpu.dot_dimension_numbers<[1], [0], [0], [1], [0, 0, 1, 1], [], []>} : vector<2x128xbf16>, vector<128x128xbf16>, vector<2x128xf32> -> vector<2x128xf32>
    %13 = vector.broadcast %4 : vector<1x128xf32> to vector<2x128xf32>
    %14 = arith.addf %12, %13 : vector<2x128xf32>
    %c0_11 = arith.constant 0 : index
    %c0_12 = arith.constant 0 : index
    %15 = vector.load %arg5[%c0_11, %c0_12] : memref<2x128xf32, #tpu.memory_space<vmem>>, vector<2x128xf32>
    tpu.vector_store %arg5[%c0_11, %c0_12], %14 {strides = array<i32>} : memref<2x128xf32, #tpu.memory_space<vmem>>, vector<2x128xf32>,
    return
  }
}

</mosaic_0001>

<bundles_post_ra>
// kernel: model_fn.1
= control target key start
LH: loop header
LB: loop body
LE: loop exit
PB: predicated region body
PF: predicated region fallthrough
CT: control target
= control target key end

     0   :  { %10 = vsyncpa [#allocation3], 0  ;;  %s1283_s0 = inlined_call_operand.vmem [shape: f32[2,1024], index: 0, kind: input, shape index: {}]   ;;  %s1284_s1 = inlined_call_operand.hbm [shape: bf16[1024,128], index: 1, kind: input, shape index: {}]   ;;  %s1285_s2 = inlined_call_operand.vmem [shape: f32[1,128], index: 2, kind: input, shape index: {}, may-alias: {2,4}]   ;;  %s1286_s3 = inlined_call_operand.vmem [shape: bf16[128,128], index: 3, kind: input, shape index: {}]   ;;  %s1287_s4 = inlined_call_operand.vmem [shape: f32[1,128], index: 4, kind: input, shape index: {}, may-alias: {2,4}]   ;;  %s1288_s5 = inlined_call_operand.hbm [shape: f32[2,128], index: 5, kind: output, shape index: {}]  }
   0x1   :  { %11 = vsyncpa [#allocation4], 0  ;;  %s18_s20 = sshll.u32 %s1284_s1, 4  ;;  %s1207_s21 = smov [#allocation2]   ;;  %s19_s20 = int_to_ptr.hbm [resolvable:$true] %s18_s20 }
   0x2   :  { %s20_s22 = sshll.u32 %s1207_s21, 4  ;;  %s1208_s23 = smov 64   ;;  %s21_s22 = int_to_ptr.vmem [resolvable:$true] %s20_s22 }
   0x3   :  { %s1209_s24 = smov 4  }
   0x4   :  { %26 = dma.hbm_to_vmem [thread:$0]  %s19_s20, 8192, %s21_s22, [#allocation3], %s1208_s23, %s1208_s23, %s1209_s24  }
   0x5   :  { %1203 = dma.done.wait [#allocation3], 8192  }
   0x6   :  { %1204 = vsyncadd [#allocation3], 4294959104  ;;  %v1084_v0 = vld [vmem:[#allocation2 + $0x38] sm:$0xff]  ;;  %v1083_v4 = vld [vmem:[#allocation2 + $0x30] sm:$0xff]  ;;  %s1210_s20 = smov [#allocation5]   ;;  %s779_s24 = sshll.u32 %s1288_s5, 4  ;;  %s780_s24 = int_to_ptr.hbm [resolvable:$true] %s779_s24 }
   0x7   :  { %v1092_v1 = vld [vmem:[#allocation2 + $0x78] sm:$0xff]  ;;  %601 = vmatpush.bf16.msra.mxu0 %v1084_v0  ;;  %v1091_v5 = vld [vmem:[#allocation2 + $0x70] sm:$0xff]  ;;  %v1082_v8 = vld [vmem:[#allocation2 + $0x28] sm:$0xff]  ;;  %s777_s21 = sshll.u32 %s1210_s20, 4  ;;  %s778_s21 = int_to_ptr.vmem [resolvable:$true] %s777_s21 }
   0x8   :  { %v1100_v2 = vld [vmem:[#allocation2 + $0xb8] sm:$0xff]  ;;  %614 = vmatpush.bf16.msra.mxu1 %v1092_v1  ;;  %v1099_v6 = vld [vmem:[#allocation2 + $0xb0] sm:$0xff]  ;;  %v1090_v9 = vld [vmem:[#allocation2 + $0x68] sm:$0xff] }
   0x9   :  { %v1108_v3 = vld [vmem:[#allocation2 + $0xf8] sm:$0xff]  ;;  %627 = vmatpush.bf16.msra.mxu2 %v1100_v2  ;;  %v1107_v7 = vld [vmem:[#allocation2 + $0xf0] sm:$0xff]  ;;  %v1098_v10 = vld [vmem:[#allocation2 + $0xa8] sm:$0xff] }
   0xa   :  { %640 = vmatpush.bf16.msra.mxu3 %v1108_v3  ;;  %v1106_v11 = vld [vmem:[#allocation2 + $0xe8] sm:$0xff]  ;;  %v1081_v12 = vld [vmem:[#allocation2 + $0x20] sm:$0xff]  ;;  %v37_v16 = vld [vmem:[%s1283_s0] sm:$0xff] }
   0xb   :  { %602 = vmatpush.bf16.msra.mxu0 %v1083_v4  ;;  %v1089_v13 = vld [vmem:[#allocation2 + $0x60] sm:$0xff]  ;;  %v1080_v17 = vld [vmem:[#allocation2 + $0x18] sm:$0xff]  ;;  %187 = vst [vmem:[#allocation1] ss:$4 sm:$0xff] %v37_v16  ;;  %v1079_v21 = vld [vmem:[#allocation2 + $0x10] sm:$0xff] }
   0xc   :  { %615 = vmatpush.bf16.msra.mxu1 %v1091_v5  ;;  %v1097_v14 = vld [vmem:[#allocation2 + $0xa0] sm:$0xff]  ;;  %v1088_v18 = vld [vmem:[#allocation2 + $0x58] sm:$0xff]  ;;  %v1087_v22 = vld [vmem:[#allocation2 + $0x50] sm:$0xff] }
   0xd   :  { %628 = vmatpush.bf16.msra.mxu2 %v1099_v6  ;;  %v1105_v15 = vld [vmem:[#allocation2 + $0xe0] sm:$0xff]  ;;  %v1096_v19 = vld [vmem:[#allocation2 + $0x98] sm:$0xff]  ;;  %v1095_v23 = vld [vmem:[#allocation2 + $0x90] sm:$0xff] }
   0xe   :  { %641 = vmatpush.bf16.msra.mxu3 %v1107_v7  ;;  %v1104_v20 = vld [vmem:[#allocation2 + $0xd8] sm:$0xff]  ;;  %v1103_v24 = vld [vmem:[#allocation2 + $0xd0] sm:$0xff]  ;;  %v1078_v25 = vld [vmem:[#allocation2 + $0x8] sm:$0xff] }
   0xf   :  { %603 = vmatpush.bf16.msra.mxu0 %v1082_v8  ;;  %v1086_v26 = vld [vmem:[#allocation2 + $0x48] sm:$0xff]  ;;  %v38_v29 = vld [vmem:[%s1283_s0 + $0x8] sm:$0xff]  ;;  %v1116_v34 = vld [vmem:[#allocation2 + $0x138] sm:$0xff] }
  0x10   :  { %616 = vmatpush.bf16.msra.mxu1 %v1090_v9  ;;  %v1094_v27 = vld [vmem:[#allocation2 + $0x88] sm:$0xff]  ;;  %v1077_v30 = vld [vmem:[#allocation2] sm:$0xff]  ;;  %189 = vst [vmem:[#allocation1 + $0x20] ss:$4 sm:$0xff] %v38_v29  ;;  %v1124_v35 = vld [vmem:[#allocation2 + $0x178] sm:$0xff] }
  0x11   :  { %629 = vmatpush.bf16.msra.mxu2 %v1098_v10  ;;  %v1102_v28 = vld [vmem:[#allocation2 + $0xc8] sm:$0xff]  ;;  %v1085_v31 = vld [vmem:[#allocation2 + $0x40] sm:$0xff]  ;;  %v1132_v40 = vld [vmem:[#allocation2 + $0x1b8] sm:$0xff] }
  0x12   :  { %642 = vmatpush.bf16.msra.mxu3 %v1106_v11  ;;  %v1093_v32 = vld [vmem:[#allocation2 + $0x80] sm:$0xff]  ;;  %v192_v36 = vld.sshfl [vmem:[#allocation1 + $0x10] sm:$0xff pattern:$0x73625140]  ;;  %v1140_v41 = vld [vmem:[#allocation2 + $0x1f8] sm:$0xff] }
  0x13   :  { %604 = vmatpush.bf16.msra.mxu0 %v1081_v12  ;;  %v1101_v33 = vld [vmem:[#allocation2 + $0xc0] sm:$0xff]  ;;  %v190_v37 = vld.sshfl [vmem:[#allocation1] sm:$0xff pattern:$0x73625140]  ;;  %v208_v42 = vpack.c.bf16 %v192_v36, %v192_v36  ;;  %v1115_v46 = vld [vmem:[#allocation2 + $0x130] sm:$0xff] }
  0x14   :  { %617 = vmatpush.bf16.msra.mxu1 %v1089_v13  ;;  %v193_v38 = vld.sshfl [vmem:[#allocation1 + $0x18] sm:$0xff pattern:$0x73625140]  ;;  %v191_v39 = vld.sshfl [vmem:[#allocation1 + $0x8] sm:$0xff pattern:$0x73625140]  ;;  %v206_v43 = vpack.c.bf16 %v190_v37, %v190_v37 }
  0x15   :  { %630 = vmatpush.bf16.msra.mxu2 %v1097_v14  ;;  %v209_v44 = vpack.c.bf16 %v193_v38, %v193_v38  ;;  %v207_v45 = vpack.c.bf16 %v191_v39, %v191_v39  ;;  %v1123_v47 = vld [vmem:[#allocation2 + $0x170] sm:$0xff]  ;;  %v1114_v50 = vld [vmem:[#allocation2 + $0x128] sm:$0xff]  ;;  %v1113_v54 = vld [vmem:[#allocation2 + $0x120] sm:$0xff] }
  0x16   :  { %643 = vmatpush.bf16.msra.mxu3 %v1105_v15  ;;  %v1131_v48 = vld [vmem:[#allocation2 + $0x1b0] sm:$0xff]  ;;  %v1122_v51 = vld [vmem:[#allocation2 + $0x168] sm:$0xff]  ;;  %v1121_v55 = vld [vmem:[#allocation2 + $0x160] sm:$0xff] }
  0x17   :  { %605 = vmatpush.bf16.msra.mxu0 %v1080_v17  ;;  %v1139_v49 = vld [vmem:[#allocation2 + $0x1f0] sm:$0xff]  ;;  %v1130_v52 = vld [vmem:[#allocation2 + $0x1a8] sm:$0xff]  ;;  %v1129_v56 = vld [vmem:[#allocation2 + $0x1a0] sm:$0xff] }
  0x18   :  { %618 = vmatpush.bf16.msra.mxu1 %v1088_v18  ;;  %v1138_v53 = vld [vmem:[#allocation2 + $0x1e8] sm:$0xff]  ;;  %v1137_v57 = vld [vmem:[#allocation2 + $0x1e0] sm:$0xff]  ;;  %v1112_v58 = vld [vmem:[#allocation2 + $0x118] sm:$0xff] }
  0x19   :  { %631 = vmatpush.bf16.msra.mxu2 %v1096_v19  ;;  %v1120_v59 = vld [vmem:[#allocation2 + $0x158] sm:$0xff]  ;;  %v1111_v62 = vld [vmem:[#allocation2 + $0x110] sm:$0xff]  ;;  %v1110_v2 = vld [vmem:[#allocation2 + $0x108] sm:$0xff] }
  0x1a   :  { %644 = vmatpush.bf16.msra.mxu3 %v1104_v20  ;;  %v1128_v60 = vld [vmem:[#allocation2 + $0x198] sm:$0xff]  ;;  %v1119_v63 = vld [vmem:[#allocation2 + $0x150] sm:$0xff]  ;;  %v1118_v3 = vld [vmem:[#allocation2 + $0x148] sm:$0xff] }
  0x1b   :  { %606 = vmatpush.bf16.msra.mxu0 %v1079_v21  ;;  %v1136_v61 = vld [vmem:[#allocation2 + $0x1d8] sm:$0xff]  ;;  %v1127_v0 = vld [vmem:[#allocation2 + $0x190] sm:$0xff]  ;;  %v1126_v4 = vld [vmem:[#allocation2 + $0x188] sm:$0xff] }
  0x1c   :  { %619 = vmatpush.bf16.msra.mxu1 %v1087_v22  ;;  %v1135_v1 = vld [vmem:[#allocation2 + $0x1d0] sm:$0xff]  ;;  %v1134_v5 = vld [vmem:[#allocation2 + $0x1c8] sm:$0xff]  ;;  %v1109_v6 = vld [vmem:[#allocation2 + $0x100] sm:$0xff] }
  0x1d   :  { %632 = vmatpush.bf16.msra.mxu2 %v1095_v23  ;;  %v1117_v7 = vld [vmem:[#allocation2 + $0x140] sm:$0xff]  ;;  %v194_v10 = vld.sshfl [vmem:[#allocation1 + $0x20] sm:$0xff pattern:$0x73625140]  ;;  %v1148_v18 = vld [vmem:[%s1286_s3 + $0x38] sm:$0xff] }
  0x1e   :  { %645 = vmatpush.bf16.msra.mxu3 %v1103_v24  ;;  %v1125_v8 = vld [vmem:[#allocation2 + $0x180] sm:$0xff]  ;;  %v196_v12 = vld.sshfl [vmem:[#allocation1 + $0x30] sm:$0xff pattern:$0x73625140]  ;;  %v210_v14 = vpack.c.bf16 %v194_v10, %v194_v10  ;;  %v1145_v21 = vld [vmem:[%s1286_s3 + $0x20] sm:$0xff] }
  0x1f   :  { %607 = vmatpush.bf16.msra.mxu0 %v1078_v25  ;;  %v1133_v9 = vld [vmem:[#allocation2 + $0x1c0] sm:$0xff]  ;;  %v197_v13 = vld.sshfl [vmem:[#allocation1 + $0x38] sm:$0xff pattern:$0x73625140]  ;;  %v212_v16 = vpack.c.bf16 %v196_v12, %v196_v12  ;;  %v1147_v19 = vld [vmem:[%s1286_s3 + $0x30] sm:$0xff] }
  0x20   :  { %620 = vmatpush.bf16.msra.mxu1 %v1086_v26  ;;  %v195_v11 = vld.sshfl [vmem:[#allocation1 + $0x28] sm:$0xff pattern:$0x73625140]  ;;  %v213_v17 = vpack.c.bf16 %v197_v13, %v197_v13  ;;  %v1144_v22 = vld [vmem:[%s1286_s3 + $0x18] sm:$0xff]  ;;  %v1143_v24 = vld [vmem:[%s1286_s3 + $0x10] sm:$0xff] }
  0x21   :  { %633 = vmatpush.bf16.msra.mxu2 %v1094_v27  ;;  %v211_v15 = vpack.c.bf16 %v195_v11, %v195_v11  ;;  %v1146_v20 = vld [vmem:[%s1286_s3 + $0x28] sm:$0xff] }
  0x22   :  { %646 = vmatpush.bf16.msra.mxu3 %v1102_v28  ;;  %v1142_v26 = vld [vmem:[%s1286_s3 + $0x8] sm:$0xff] }
  0x23   :  { %608 = vmatpush.bf16.msra.mxu0 %v1077_v30  ;;  %v1141_v30 = vld [vmem:[%s1286_s3] sm:$0xff] }
  0x24   :  { %621 = vmatpush.bf16.msra.mxu1 %v1085_v31 }
  0x25   :  { %634 = vmatpush.bf16.msra.mxu2 %v1093_v32  ;;  %v1153_v32 = vld [vmem:[%s1285_s2] ss:$0 sm:$0xff] }
  0x26   :  { %647 = vmatpush.bf16.msra.mxu3 %v1101_v33  ;;  %609 = vmatmul.bf16.vlgmr.msra.gmra.mxu0 %v206_v43 }
  0x27   :  { %653 = vmatpush.bf16.msrb.mxu0 %v1116_v34  ;;  %622 = vmatmul.bf16.vlgmr.msra.gmra.mxu1 %v207_v45 }
  0x28   :  { %666 = vmatpush.bf16.msrb.mxu1 %v1124_v35  ;;  %635 = vmatmul.bf16.vlgmr.msra.gmra.mxu2 %v208_v42 }
  0x29   :  { %679 = vmatpush.bf16.msrb.mxu2 %v1132_v40  ;;  %648 = vmatmul.bf16.vlgmr.msra.gmra.mxu3 %v209_v44 }
  0x2a   :  { %692 = vmatpush.bf16.msrb.mxu3 %v1140_v41 }
  0x2b   :  { %654 = vmatpush.bf16.msrb.mxu0 %v1115_v46 }
  0x2c   :  { %667 = vmatpush.bf16.msrb.mxu1 %v1123_v47 }
  0x2d   :  { %680 = vmatpush.bf16.msrb.mxu2 %v1131_v48 }
  0x2e   :  { %693 = vmatpush.bf16.msrb.mxu3 %v1139_v49 }
  0x2f   :  { %655 = vmatpush.bf16.msrb.mxu0 %v1114_v50 }
  0x30   :  { %668 = vmatpush.bf16.msrb.mxu1 %v1122_v51 }
  0x31   :  { %681 = vmatpush.bf16.msrb.mxu2 %v1130_v52 }
  0x32   :  { %694 = vmatpush.bf16.msrb.mxu3 %v1138_v53  ;;  %v1154_v53 = vld [vmem:[%s1287_s4] ss:$0 sm:$0xff] }
  0x33   :  { %656 = vmatpush.bf16.msrb.mxu0 %v1113_v54 }
  0x34   :  { %669 = vmatpush.bf16.msrb.mxu1 %v1121_v55 }
  0x35   :  { %682 = vmatpush.bf16.msrb.mxu2 %v1129_v56 }
  0x36   :  { %695 = vmatpush.bf16.msrb.mxu3 %v1137_v57 }
  0x37   :  { %657 = vmatpush.bf16.msrb.mxu0 %v1112_v58 }
  0x38   :  { %670 = vmatpush.bf16.msrb.mxu1 %v1120_v59 }
  0x39   :  { %683 = vmatpush.bf16.msrb.mxu2 %v1128_v60 }
  0x3a   :  { %696 = vmatpush.bf16.msrb.mxu3 %v1136_v61 }
  0x3b   :  { %658 = vmatpush.bf16.msrb.mxu0 %v1111_v62 }
  0x3c   :  { %671 = vmatpush.bf16.msrb.mxu1 %v1119_v63 }
  0x3d   :  { %684 = vmatpush.bf16.msrb.mxu2 %v1127_v0 }
  0x3e   :  { %697 = vmatpush.bf16.msrb.mxu3 %v1135_v1 }
  0x3f   :  { %659 = vmatpush.bf16.msrb.mxu0 %v1110_v2 }
  0x40   :  { %672 = vmatpush.bf16.msrb.mxu1 %v1118_v3 }
  0x41   :  { %685 = vmatpush.bf16.msrb.mxu2 %v1126_v4 }
  0x42   :  { %698 = vmatpush.bf16.msrb.mxu3 %v1134_v5 }
  0x43   :  { %660 = vmatpush.bf16.msrb.mxu0 %v1109_v6 }
  0x44   :  { %673 = vmatpush.bf16.msrb.mxu1 %v1117_v7 }
  0x45   :  { %686 = vmatpush.bf16.msrb.mxu2 %v1125_v8 }
  0x46   :  { %699 = vmatpush.bf16.msrb.mxu3 %v1133_v9  ;;  %661 = vmatmul.bf16.vlgmr.msrb.gmra.mxu0 %v210_v14 }
  0x47   :  { %674 = vmatmul.bf16.vlgmr.msrb.gmra.mxu1 %v211_v15  ;;  %758 = vmatpush.bf16.msra.mxu0 %v1148_v18 }
  0x48   :  { %687 = vmatmul.bf16.vlgmr.msrb.gmra.mxu2 %v212_v16 }
  0x49   :  { %700 = vmatmul.bf16.vlgmr.msrb.gmra.mxu3 %v213_v17 }
  0x4b   :  { %759 = vmatpush.bf16.msra.mxu0 %v1147_v19 }
  0x4f   :  { %760 = vmatpush.bf16.msra.mxu0 %v1146_v20 }
  0x53   :  { %761 = vmatpush.bf16.msra.mxu0 %v1145_v21 }
  0x57   :  { %762 = vmatpush.bf16.msra.mxu0 %v1144_v22 }
  0x5b   :  { %763 = vmatpush.bf16.msra.mxu0 %v1143_v24 }
  0x5f   :  { %764 = vmatpush.bf16.msra.mxu0 %v1142_v26 }
  0x63   :  { %765 = vmatpush.bf16.msra.mxu0 %v1141_v30 }
  0xa3   :  { %v610_v23 = vpop.f32.mrf.mxu0 }
  0xa4   :  { %v623_v25 = vpop.f32.mrf.mxu1  ;;  %v611_v35 = vadd.f32 %v1153_v32, %v610_v23 }
  0xa6   :  { %v624_v36 = vadd.f32 %v623_v25, %v611_v35 }
  0xab   :  { %v636_v27 = vpop.f32.mrf.mxu2  ;;  %v612_v29 = vpop.f32.mrf.mxu0 }
  0xac   :  { %v649_v28 = vpop.f32.mrf.mxu3  ;;  %v625_v31 = vpop.f32.mrf.mxu1  ;;  %v637_v37 = vadd.f32 %v636_v27, %v624_v36 }
  0xae   :  { %v650_v38 = vadd.f32 %v649_v28, %v637_v37 }
  0xb3   :  { %v638_v33 = vpop.f32.mrf.mxu2 }
  0xb4   :  { %v651_v34 = vpop.f32.mrf.mxu3 }
  0xc3   :  { %v662_v39 = vpop.f32.mrf.mxu0 }
  0xc4   :  { %v675_v40 = vpop.f32.mrf.mxu1  ;;  %v663_v41 = vadd.f32 %v662_v39, %v650_v38 }
  0xc6   :  { %v676_v42 = vadd.f32 %v675_v40, %v663_v41 }
  0xcb   :  { %v688_v43 = vpop.f32.mrf.mxu2  ;;  %v664_v46 = vpop.f32.mrf.mxu0 }
  0xcc   :  { %v701_v44 = vpop.f32.mrf.mxu3  ;;  %v689_v45 = vadd.f32 %v688_v43, %v676_v42  ;;  %v677_v47 = vpop.f32.mrf.mxu1 }
  0xce   :  { %v702_v48 = vadd.f32 %v701_v44, %v689_v45 }
  0xd0   :  { %v705_v49 = vmax.f32 %v702_v48, 0.0 }
  0xd2   :  { %v706_v50 = vpack.c.bf16 %v705_v49, %v705_v49 }
  0xd3   :  { %v690_v51 = vpop.f32.mrf.mxu2 }
  0xd4   :  { %v703_v52 = vpop.f32.mrf.mxu3  ;;  %766 = vmatmul.bf16.vlgmr.msra.gmra.mxu0 %v706_v50 }
 0x151   :  { %v767_v54 = vpop.f32.mrf.mxu0 }
 0x152   :  { %v768_v55 = vadd.f32 %v1154_v53, %v767_v54 }
 0x154   :  { %771 = vst [vmem:[#allocation5] sm:$0x3] %v768_v55 }
 0x155   :  { %782 = dma.vmem_to_hbm [thread:$0]  %s778_s21, 32, %s780_s24, [#allocation4]  }
 0x159   :  { %v769_v56 = vpop.f32.mrf.mxu0 }
 0x15a   :  { %1205 = dma.done.wait [#allocation4], 32  }
 0x15b   :  { %1206 = vsyncadd [#allocation4], 4294967264 }
 0x15c   :  { %787 = vsyncpa [#allocation3], 1 }
 0x15d   :  { %788 = vsyncpa [#allocation4], 1 }

</bundles_post_ra>
